<compile_context>
chip_gen: v7x
topology: tpu7x:2x2x1
jax: 0.10.0
libtpu: 0.0.40
codegen_flags: <defaults>
</compile_context>

<pallas_src>
import jax
import jax.numpy as jnp
from jax.experimental import pallas as pl
from jax.experimental.pallas import tpu as pltpu
from functools import partial


def _round_up(a: int, b: int) -> int:
    return -(-a // b) * b


def _adaln_kernel(x_ref, e_ref, ww_ref, wb_ref, bw_ref, bb_ref, g_ref, be_ref,
                  o_ref, *, eps, cast_matmul_to_bf16):
    # ---- LayerNorm over the hidden dim; statistics in f32 (numerics).
    #      One-pass moments: var = E[x^2] - mean^2 (guarded against
    #      cancellation going slightly negative). ----
    x = x_ref[...].astype(jnp.float32)
    mean = jnp.mean(x, axis=-1, keepdims=True)
    mean_sq = jnp.mean(x * x, axis=-1, keepdims=True)
    var = jnp.maximum(mean_sq - mean * mean, 0.0)
    xn = (x - mean) * jax.lax.rsqrt(var + eps)
    xn = xn * g_ref[...].astype(jnp.float32) + be_ref[...].astype(jnp.float32)

    # ---- Adaptive scale / shift: two MXU dots.  The (D, 2D) projection is
    #      split into two (D, D) halves so the kernel produces w and b
    #      directly (no wide lane slab, no slicing).  f32 operands are cast
    #      to bf16 for the MXU (f32 accumulation) unless the caller asked for
    #      exact-f32 dots. ----
    e = e_ref[...]
    ww = ww_ref[...]
    wb = wb_ref[...]
    if cast_matmul_to_bf16 and e.dtype == jnp.float32:
        e = e.astype(jnp.bfloat16)
    if cast_matmul_to_bf16 and ww.dtype == jnp.float32:
        ww = ww.astype(jnp.bfloat16)
        wb = wb.astype(jnp.bfloat16)

    w = jnp.dot(e, ww, preferred_element_type=jnp.float32)
    w = w + bw_ref[...].astype(jnp.float32)
    b = jnp.dot(e, wb, preferred_element_type=jnp.float32)
    b = b + bb_ref[...].astype(jnp.float32)

    o_ref[...] = (w * xn + b).astype(o_ref.dtype)


def adaptive_layer_norm(x, emb, wp_w, wp_b, bp_w, bp_b, gamma, beta,
                        *, eps=1e-5, row_tile=256, cast_matmul_to_bf16=True):
    """AdaptiveLayerNorm forward.

    x, emb        : (B, T, D)
    wp_w, wp_b    : (D, D)   -- the two halves of the Linear(D, 2D) weight,
                               stored transposed so the kernel computes e @ W.
    bp_w, bp_b    : (D,)     -- the two halves of the Linear bias.
    gamma, beta   : (D,)     -- LayerNorm affine parameters.
    row_tile      : rows per grid step.  256+ recommended on v6e/v7x,
                    128-256 on v5e.  Ragged tails are masked by Pallas (no
                    wrapper padding copies).
    cast_matmul_to_bf16 : when inputs/weights are f32, feed the MXU bf16
                    operands (f32 accumulation).  Set False for exact f32.

    Production note: D should be a multiple of 128 (ideally >= 256 on
    v6e/v7x) for lane-dense, unmasked stores and a full MXU contraction.
    """
    B, T, D = x.shape
    N = B * T

    # Clamp the tile so tiny inputs don't compute on a mostly-OOB block, but
    # keep it a multiple of 16 (bf16 sublane packing / (8,128) rule).
    row_tile = max(16, min(row_tile, _round_up(N, 16)))
    row_tile = _round_up(row_tile, 16)
    n_tiles = pl.cdiv(N, row_tile)

    # Free, contiguous reshapes (no HBM copies).
    x2 = x.reshape(N, D)
    e2 = emb.reshape(N, D)
    bpw2 = bp_w.reshape(1, D)
    bpb2 = bp_b.reshape(1, D)
    g2 = gamma.reshape(1, D)
    be2 = beta.reshape(1, D)

    kernel = partial(_adaln_kernel, eps=eps,
                     cast_matmul_to_bf16=cast_matmul_to_bf16)

    itemsize = jnp.dtype(x.dtype).itemsize
    w_itemsize = jnp.dtype(wp_w.dtype).itemsize

    # VMEM budget: double-buffered x/emb/out tiles + two (D, D) weight halves
    # (2 buffers each; grid-invariant so no re-DMA) + f32 temps headroom.
    tile_bytes = row_tile * D * itemsize
    est = (2 * 3 * tile_bytes
           + 2 * 2 * D * D * w_itemsize
           + 8 * row_tile * D * 4
           + 16 * D * 4)
    desired = max(32 * 1024 * 1024, 2 * est)
    try:
        # Hardware probe only (e.g. 64 MiB/TC on v7x, 128 MiB on v5e/v6e).
        vmem_cap = int(pltpu.get_tpu_info().vmem_capacity_bytes)
    except Exception:
        vmem_cap = 64 * 1024 * 1024  # conservative default (fits every chip)
    vmem_limit = int(min(desired, int(0.85 * vmem_cap)))

    cost = pl.CostEstimate(
        flops=4 * N * D * D + 10 * N * D,        # projection dots + LN elementwise
        transcendentals=N,                       # rsqrt per row
        bytes_accessed=3 * N * D * itemsize + 2 * D * D * w_itemsize
                       + 6 * D * itemsize,
    )

    out = pl.pallas_call(
        kernel,
        out_shape=jax.ShapeDtypeStruct((N, D), x.dtype),
        grid_spec=pltpu.PrefetchScalarGridSpec(
            num_scalar_prefetch=0,
            grid=(n_tiles,),
            in_specs=[
                pl.BlockSpec((row_tile, D), lambda i: (i, 0)),  # input rows
                pl.BlockSpec((row_tile, D), lambda i: (i, 0)),  # embedding rows
                pl.BlockSpec((D, D), lambda i: (0, 0)),  # proj weight -> scale
                pl.BlockSpec((D, D), lambda i: (0, 0)),  # proj weight -> shift
                pl.BlockSpec((1, D), lambda i: (0, 0)),  # proj bias (scale half)
                pl.BlockSpec((1, D), lambda i: (0, 0)),  # proj bias (shift half)
                pl.BlockSpec((1, D), lambda i: (0, 0)),  # LN gamma
                pl.BlockSpec((1, D), lambda i: (0, 0)),  # LN beta
            ],
            out_specs=pl.BlockSpec((row_tile, D), lambda i: (i, 0)),
        ),
        compiler_params=pltpu.CompilerParams(
            dimension_semantics=("parallel",),
            vmem_limit_bytes=vmem_limit,
        ),
        cost_estimate=cost,
    )(x2, e2, wp_w, wp_b, bpw2, bpb2, g2, be2)

    return out.reshape(B, T, D)


def _reference(x, emb, wp, bp, gamma, beta, eps=1e-5):
    x = x.astype(jnp.float32)
    emb = emb.astype(jnp.float32)
    mean = jnp.mean(x, axis=-1, keepdims=True)
    var = jnp.mean((x - mean) ** 2, axis=-1, keepdims=True)
    xn = (x - mean) / jnp.sqrt(var + eps) * gamma.astype(jnp.float32) \
         + beta.astype(jnp.float32)
    proj = emb @ wp.astype(jnp.float32) + bp.astype(jnp.float32)
    D = x.shape[-1]
    w, b = proj[..., :D], proj[..., D:]
    return w * xn + b


if __name__ == "__main__":
    B, T, D = 2, 8, 32   # d_model = 32 (production D should be a multiple of 128)
    eps = 1e-5

    key = jax.random.PRNGKey(0)
    k_x, k_e, k_w, k_b, k_g, k_bt = jax.random.split(key, 6)

    x = jax.random.normal(k_x, (B, T, D), dtype=jnp.float32)
    emb = jax.random.normal(k_e, (B, T, D), dtype=jnp.float32)

    # project_layer: nn.Linear(d_model, 2*d_model); stored transposed (D, 2D)
    # and split into the scale / shift halves for the kernel.
    wp = jax.random.normal(k_w, (D, 2 * D), dtype=jnp.float32) * 0.05
    bp = jax.random.normal(k_b, (2 * D,), dtype=jnp.float32) * 0.05
    gamma = 1.0 + 0.1 * jax.random.normal(k_g, (D,), dtype=jnp.float32)
    beta = 0.1 * jax.random.normal(k_bt, (D,), dtype=jnp.float32)

    wp_w, wp_b = wp[:, :D], wp[:, D:]
    bp_w, bp_b = bp[:D], bp[D:]

    ref = _reference(x, emb, wp, bp, gamma, beta, eps=eps)

    # ---- f32, exact MXU operands (validation path) ----
    out = adaptive_layer_norm(x, emb, wp_w, wp_b, bp_w, bp_b, gamma, beta,
                              eps=eps, cast_matmul_to_bf16=False)
    out = jax.block_until_ready(out)
    assert jnp.allclose(out, ref, atol=5e-4, rtol=5e-4), "f32 exact mismatch"

    # ---- f32 inputs, bf16 MXU operands (default fast path) ----
    out_fast = adaptive_layer_norm(x, emb, wp_w, wp_b, bp_w, bp_b, gamma, beta,
                                   eps=eps)
    out_fast = jax.block_until_ready(out_fast)
    assert jnp.allclose(out_fast, ref, atol=2e-2, rtol=2e-2), \
        "f32 (bf16-MXU) mismatch"

    # ---- bf16 path (native-dtype MXU operands, f32 accumulation) ----
    xb = x.astype(jnp.bfloat16)
    eb = emb.astype(jnp.bfloat16)
    out_bf = adaptive_layer_norm(
        xb, eb,
        wp_w.astype(jnp.bfloat16), wp_b.astype(jnp.bfloat16),
        bp_w.astype(jnp.bfloat16), bp_b.astype(jnp.bfloat16),
        gamma.astype(jnp.bfloat16), beta.astype(jnp.bfloat16), eps=eps)
    out_bf = jax.block_until_ready(out_bf)
    ref_bf = _reference(xb, eb, wp.astype(jnp.bfloat16), bp.astype(jnp.bfloat16),
                        gamma.astype(jnp.bfloat16), beta.astype(jnp.bfloat16),
                        eps=eps)
    assert jnp.allclose(out_bf.astype(jnp.float32), ref_bf, atol=5e-2, rtol=5e-2), \
        "bf16 mismatch vs reference"

    print("KERNEL_OK")
</pallas_src>

<mosaic_0001>
module attributes {stable_mosaic.version = 11 : i64} {
  func.func @_adaln_kernel(%arg0: i32, %arg1: memref<16x32xf32, #tpu.memory_space<vmem>>, %arg2: memref<16x32xf32, #tpu.memory_space<vmem>>, %arg3: memref<32x32xf32, #tpu.memory_space<vmem>>, %arg4: memref<32x32xf32, #tpu.memory_space<vmem>>, %arg5: memref<1x32xf32, #tpu.memory_space<vmem>>, %arg6: memref<1x32xf32, #tpu.memory_space<vmem>>, %arg7: memref<1x32xf32, #tpu.memory_space<vmem>>, %arg8: memref<1x32xf32, #tpu.memory_space<vmem>>, %arg9: memref<16x32xf32, #tpu.memory_space<vmem>>) attributes {dimension_semantics = [#tpu.dimension_semantics<parallel>], iteration_bounds = array<i64: 1>, scalar_prefetch = 0 : i64, scratch_operands = 0 : i64, tpu.core_type = #tpu.core_type<tc>, window_params = [{transform_indices = @transform_0, window_bounds = array<i64: 16, 32>}, {transform_indices = @transform_1, window_bounds = array<i64: 16, 32>}, {pipeline_mode = #tpu.pipeline_mode<synchronous>, transform_indices = @transform_2, window_bounds = array<i64: 32, 32>}, {pipeline_mode = #tpu.pipeline_mode<synchronous>, transform_indices = @transform_3, window_bounds = array<i64: 32, 32>}, {pipeline_mode = #tpu.pipeline_mode<synchronous>, transform_indices = @transform_4, window_bounds = array<i64: 1, 32>}, {pipeline_mode = #tpu.pipeline_mode<synchronous>, transform_indices = @transform_5, window_bounds = array<i64: 1, 32>}, {pipeline_mode = #tpu.pipeline_mode<synchronous>, transform_indices = @transform_6, window_bounds = array<i64: 1, 32>}, {pipeline_mode = #tpu.pipeline_mode<synchronous>, transform_indices = @transform_7, window_bounds = array<i64: 1, 32>}, {transform_indices = @transform_8, window_bounds = array<i64: 16, 32>}]} {
    %c0 = arith.constant 0 : index
    %c0_0 = arith.constant 0 : index
    %0 = vector.load %arg1[%c0, %c0_0] : memref<16x32xf32, #tpu.memory_space<vmem>>, vector<16x32xf32>
    %cst = arith.constant dense<0.000000e+00> : vector<16xf32>
    %1 = vector.multi_reduction <add>, %0, %cst [1] : vector<16x32xf32> to vector<16xf32>
    %2 = vector.shape_cast %1 : vector<16xf32> to vector<16x1xf32>
    %cst_1 = arith.constant 3.200000e+01 : f32
    %3 = vector.broadcast %cst_1 : f32 to vector<16x1xf32>
    %4 = arith.divf %2, %3 : vector<16x1xf32>
    %5 = arith.mulf %0, %0 : vector<16x32xf32>
    %cst_2 = arith.constant dense<0.000000e+00> : vector<16xf32>
    %6 = vector.multi_reduction <add>, %5, %cst_2 [1] : vector<16x32xf32> to vector<16xf32>
    %7 = vector.shape_cast %6 : vector<16xf32> to vector<16x1xf32>
    %cst_3 = arith.constant 3.200000e+01 : f32
    %8 = vector.broadcast %cst_3 : f32 to vector<16x1xf32>
    %9 = arith.divf %7, %8 : vector<16x1xf32>
    %10 = arith.mulf %4, %4 : vector<16x1xf32>
    %11 = arith.subf %9, %10 : vector<16x1xf32>
    %cst_4 = arith.constant 0.000000e+00 : f32
    %12 = vector.broadcast %cst_4 : f32 to vector<16x1xf32>
    %13 = arith.maximumf %11, %12 : vector<16x1xf32>
    %14 = vector.broadcast %4 : vector<16x1xf32> to vector<16x32xf32>
    %15 = arith.subf %0, %14 : vector<16x32xf32>
    %cst_5 = arith.constant 9.99999974E-6 : f32
    %16 = vector.broadcast %cst_5 : f32 to vector<16x1xf32>
    %17 = arith.addf %13, %16 : vector<16x1xf32>
    %18 = math.rsqrt %17 : vector<16x1xf32>
    %19 = vector.broadcast %18 : vector<16x1xf32> to vector<16x32xf32>
    %20 = arith.mulf %15, %19 : vector<16x32xf32>
    %c0_6 = arith.constant 0 : index
    %c0_7 = arith.constant 0 : index
    %21 = vector.load %arg7[%c0_6, %c0_7] : memref<1x32xf32, #tpu.memory_space<vmem>>, vector<1x32xf32>
    %22 = vector.broadcast %21 : vector<1x32xf32> to vector<16x32xf32>
    %23 = arith.mulf %20, %22 : vector<16x32xf32>
    %c0_8 = arith.constant 0 : index
    %c0_9 = arith.constant 0 : index
    %24 = vector.load %arg8[%c0_8, %c0_9] : memref<1x32xf32, #tpu.memory_space<vmem>>, vector<1x32xf32>
    %25 = vector.broadcast %24 : vector<1x32xf32> to vector<16x32xf32>
    %26 = arith.addf %23, %25 : vector<16x32xf32>
    %c0_10 = arith.constant 0 : index
    %c0_11 = arith.constant 0 : index
    %27 = vector.load %arg2[%c0_10, %c0_11] : memref<16x32xf32, #tpu.memory_space<vmem>>, vector<16x32xf32>
    %c0_12 = arith.constant 0 : index
    %c0_13 = arith.constant 0 : index
    %28 = vector.load %arg3[%c0_12, %c0_13] : memref<32x32xf32, #tpu.memory_space<vmem>>, vector<32x32xf32>
    %c0_14 = arith.constant 0 : index
    %c0_15 = arith.constant 0 : index
    %29 = vector.load %arg4[%c0_14, %c0_15] : memref<32x32xf32, #tpu.memory_space<vmem>>, vector<32x32xf32>
    %cst_16 = arith.constant dense<0.000000e+00> : vector<16x32xf32>
    %30 = tpu.matmul %27, %28, %cst_16 {dimension_numbers = #tpu.dot_dimension_numbers<[1], [0], [0], [1], [0, 0, 1, 1], [], []>} : vector<16x32xf32>, vector<32x32xf32>, vector<16x32xf32> -> vector<16x32xf32>
    %c0_17 = arith.constant 0 : index
    %c0_18 = arith.constant 0 : index
    %31 = vector.load %arg5[%c0_17, %c0_18] : memref<1x32xf32, #tpu.memory_space<vmem>>, vector<1x32xf32>
    %32 = vector.broadcast %31 : vector<1x32xf32> to vector<16x32xf32>
    %33 = arith.addf %30, %32 : vector<16x32xf32>
    %cst_19 = arith.constant dense<0.000000e+00> : vector<16x32xf32>
    %34 = tpu.matmul %27, %29, %cst_19 {dimension_numbers = #tpu.dot_dimension_numbers<[1], [0], [0], [1], [0, 0, 1, 1], [], []>} : vector<16x32xf32>, vector<32x32xf32>, vector<16x32xf32> -> vector<16x32xf32>
    %c0_20 = arith.constant 0 : index
    %c0_21 = arith.constant 0 : index
    %35 = vector.load %arg6[%c0_20, %c0_21] : memref<1x32xf32, #tpu.memory_space<vmem>>, vector<1x32xf32>
    %36 = vector.broadcast %35 : vector<1x32xf32> to vector<16x32xf32>
    %37 = arith.addf %34, %36 : vector<16x32xf32>
    %38 = arith.mulf %33, %26 : vector<16x32xf32>
    %39 = arith.addf %38, %37 : vector<16x32xf32>
    %c0_22 = arith.constant 0 : index
    %c0_23 = arith.constant 0 : index
    %40 = vector.load %arg9[%c0_22, %c0_23] : memref<16x32xf32, #tpu.memory_space<vmem>>, vector<16x32xf32>
    tpu.vector_store %arg9[%c0_22, %c0_23], %39 {strides = array<i32>} : memref<16x32xf32, #tpu.memory_space<vmem>>, vector<16x32xf32>,
    return
  }
  func.func @transform_0(%arg0: i32) -> (i32, i32) {
    %c0_i32 = arith.constant 0 : i32
    %c0_i32_0 = arith.constant 0 : i32
    return %arg0, %c0_i32 : i32, i32
  }
  func.func @transform_1(%arg0: i32) -> (i32, i32) {
    %c0_i32 = arith.constant 0 : i32
    %c0_i32_0 = arith.constant 0 : i32
    return %arg0, %c0_i32 : i32, i32
  }
  func.func @transform_2(%arg0: i32) -> (i32, i32) {
    %c0_i32 = arith.constant 0 : i32
    %c0_i32_0 = arith.constant 0 : i32
    %c0_i32_1 = arith.constant 0 : i32
    return %c0_i32, %c0_i32_0 : i32, i32
  }
  func.func @transform_3(%arg0: i32) -> (i32, i32) {
    %c0_i32 = arith.constant 0 : i32
    %c0_i32_0 = arith.constant 0 : i32
    %c0_i32_1 = arith.constant 0 : i32
    return %c0_i32, %c0_i32_0 : i32, i32
  }
  func.func @transform_4(%arg0: i32) -> (i32, i32) {
    %c0_i32 = arith.constant 0 : i32
    %c0_i32_0 = arith.constant 0 : i32
    %c0_i32_1 = arith.constant 0 : i32
    return %c0_i32, %c0_i32_0 : i32, i32
  }
  func.func @transform_5(%arg0: i32) -> (i32, i32) {
    %c0_i32 = arith.constant 0 : i32
    %c0_i32_0 = arith.constant 0 : i32
    %c0_i32_1 = arith.constant 0 : i32
    return %c0_i32, %c0_i32_0 : i32, i32
  }
  func.func @transform_6(%arg0: i32) -> (i32, i32) {
    %c0_i32 = arith.constant 0 : i32
    %c0_i32_0 = arith.constant 0 : i32
    %c0_i32_1 = arith.constant 0 : i32
    return %c0_i32, %c0_i32_0 : i32, i32
  }
  func.func @transform_7(%arg0: i32) -> (i32, i32) {
    %c0_i32 = arith.constant 0 : i32
    %c0_i32_0 = arith.constant 0 : i32
    %c0_i32_1 = arith.constant 0 : i32
    return %c0_i32, %c0_i32_0 : i32, i32
  }
  func.func @transform_8(%arg0: i32) -> (i32, i32) {
    %c0_i32 = arith.constant 0 : i32
    %c0_i32_0 = arith.constant 0 : i32
    return %arg0, %c0_i32 : i32, i32
  }
}

</mosaic_0001>

<bundles_post_ra>
// kernel: tpu_custom_call.1
= control target key start
LH: loop header
LB: loop body
LE: loop exit
PB: predicated region body
PF: predicated region fallthrough
CT: control target
= control target key end

     0   :  { %13 = vsyncpa [#allocation3], 0  ;;  %s694_s0 = inlined_call_operand.hbm [shape: f32[16,32], index: 0, kind: input, shape index: {}]   ;;  %s695_s1 = inlined_call_operand.hbm [shape: f32[16,32], index: 1, kind: input, shape index: {}]   ;;  %s696_s2 = inlined_call_operand.hbm [shape: f32[32,32], index: 2, kind: input, shape index: {}]   ;;  %s697_s3 = inlined_call_operand.hbm [shape: f32[32,32], index: 3, kind: input, shape index: {}]   ;;  %s698_s4 = inlined_call_operand.vmem [shape: f32[1,32], index: 4, kind: input, shape index: {}]   ;;  %s699_s5 = inlined_call_operand.vmem [shape: f32[1,32], index: 5, kind: input, shape index: {}]   ;;  %s700_s6 = inlined_call_operand.vmem [shape: f32[1,32], index: 6, kind: input, shape index: {}]   ;;  %s701_s7 = inlined_call_operand.vmem [shape: f32[1,32], index: 7, kind: input, shape index: {}]   ;;  %s702_s8 = inlined_call_operand.hbm [shape: f32[16,32], index: 8, kind: output, shape index: {}]  }
   0x1   :  { %14 = vsyncpa [#allocation6], 0 }
   0x2   :  { %15 = vsyncpa [#allocation9], 0 }
   0x3   :  { %16 = vsyncpa [#allocation4], 0  ;;  %s531_s27 = smov [#allocation5]   ;;  %s532_s29 = smov [#allocation2]  }
   0x4   :  { %s34_s28 = sshll.u32 %s531_s27, 4  ;;  %s22_s30 = sshll.u32 %s532_s29, 4  ;;  %s35_s28 = int_to_ptr.vmem [resolvable:$true] %s34_s28  ;;  %s583_s30 = int_to_ptr.vmem [resolvable:$true] %s22_s30 }
   0x5   :  { %s413_s11 = scalar_lea.hbm %s695_s1, 256 }
   0x6   :  { %p414_p0 = scmp.ne.s32.totalorder %s695_s1, %s413_s11  ;;  %p417_p1 = scmp.lt.u32.totalorder %s413_s11, %s695_s1 }
   0x8   :  { %p419_p2 = pnand %p417_p1, %p414_p0 }
   0xa   :  { %422 = shalt.err (!%p419_p2)
}
   0xb   :  { %s423_s16 = scalar_lea.vmem %s35_s28, 256  ;;  %p428_p4 = scmp.lt.s32.totalorder %s35_s28, %s35_s28 }
   0xc   :  { %p424_p3 = scmp.ne.s32.totalorder %s35_s28, %s423_s16  ;;  %p429_p5 = scmp.lt.s32.totalorder %s423_s16, %s423_s16 }
   0xe   :  { %p430_p6 = por %p429_p5, %p428_p4 }
  0x10   :  { %p431_p7 = pnand %p430_p6, %p424_p3 }
  0x12   :  { %434 = shalt.err (!%p431_p7)
}
  0x13   :  { %s533_s17 = smov 128   ;;  %s534_s18 = smov 8  }
  0x14   :  { %40 = dma.hbm_to_vmem [thread:$0]  %s695_s1, 256, %s35_s28, [#allocation6], %s533_s17, %s533_s17, %s534_s18  }
  0x15   :  { %s435_s23 = scalar_lea.hbm %s694_s0, 256 }
  0x16   :  { %p436_p8 = scmp.ne.s32.totalorder %s694_s0, %s435_s23  ;;  %p439_p9 = scmp.lt.u32.totalorder %s435_s23, %s694_s0 }
  0x18   :  { %p441_p10 = pnand %p439_p9, %p436_p8 }
  0x1a   :  { %444 = shalt.err (!%p441_p10)
}
  0x1b   :  { %s445_s29 = scalar_lea.vmem %s583_s30, 256  ;;  %p450_p12 = scmp.lt.s32.totalorder %s583_s30, %s583_s30 }
  0x1c   :  { %p446_p11 = scmp.ne.s32.totalorder %s583_s30, %s445_s29  ;;  %p451_p13 = scmp.lt.s32.totalorder %s445_s29, %s445_s29 }
  0x1e   :  { %p452_p0 = por %p451_p13, %p450_p12 }
  0x20   :  { %p453_p1 = pnand %p452_p0, %p446_p11 }
  0x22   :  { %456 = shalt.err (!%p453_p1)
}
  0x23   :  { %28 = dma.hbm_to_vmem [thread:$0]  %s694_s0, 256, %s583_s30, [#allocation3], %s533_s17, %s533_s17, %s534_s18  }
  0x24   :  { %s535_s9 = smov [#allocation7]   ;;  %s536_s11 = smov [#allocation8]  }
  0x25   :  { %s46_s10 = sshll.u32 %s535_s9, 4  ;;  %s58_s12 = sshll.u32 %s536_s11, 4  ;;  %s47_s10 = int_to_ptr.vmem [resolvable:$true] %s46_s10  ;;  %s620_s12 = int_to_ptr.vmem [resolvable:$true] %s58_s12 }
  0x26   :  { %s457_s15 = scalar_lea.hbm %s696_s2, 512 }
  0x27   :  { %p458_p2 = scmp.ne.s32.totalorder %s696_s2, %s457_s15  ;;  %p461_p3 = scmp.lt.u32.totalorder %s457_s15, %s696_s2 }
  0x29   :  { %p463_p4 = pnand %p461_p3, %p458_p2 }
  0x2b   :  { %466 = shalt.err (!%p463_p4)
}
  0x2c   :  { %s467_s0 = scalar_lea.vmem %s47_s10, 512  ;;  %p472_p6 = scmp.lt.s32.totalorder %s47_s10, %s47_s10 }
  0x2d   :  { %p468_p5 = scmp.ne.s32.totalorder %s47_s10, %s467_s0  ;;  %p473_p7 = scmp.lt.s32.totalorder %s467_s0, %s467_s0 }
  0x2f   :  { %p474_p8 = por %p473_p7, %p472_p6 }
  0x31   :  { %p475_p9 = pnand %p474_p8, %p468_p5 }
  0x33   :  { %478 = shalt.err (!%p475_p9)
}
  0x34   :  { %52 = dma.hbm_to_vmem [thread:$0]  %s696_s2, 512, %s47_s10, [#allocation6], %s533_s17, %s533_s17, %s534_s18  }
  0x35   :  { %s479_s25 = scalar_lea.hbm %s697_s3, 512 }
  0x36   :  { %p480_p10 = scmp.ne.s32.totalorder %s697_s3, %s479_s25  ;;  %p483_p11 = scmp.lt.u32.totalorder %s479_s25, %s697_s3 }
  0x38   :  { %p485_p12 = pnand %p483_p11, %p480_p10 }
  0x3a   :  { %488 = shalt.err (!%p485_p12)
}
  0x3b   :  { %s489_s28 = scalar_lea.vmem %s620_s12, 512  ;;  %p494_p0 = scmp.lt.s32.totalorder %s620_s12, %s620_s12 }
  0x3c   :  { %p490_p13 = scmp.ne.s32.totalorder %s620_s12, %s489_s28  ;;  %p495_p1 = scmp.lt.s32.totalorder %s489_s28, %s489_s28 }
  0x3e   :  { %p496_p2 = por %p495_p1, %p494_p0 }
  0x40   :  { %p497_p3 = pnand %p496_p2, %p490_p13 }
  0x42   :  { %500 = shalt.err (!%p497_p3)
}
  0x43   :  { %64 = dma.hbm_to_vmem [thread:$0]  %s697_s3, 512, %s620_s12, [#allocation9], %s533_s17, %s533_s17, %s534_s18  }
  0x44   :  { %523 = dma.done.wait [#allocation3], 256  }
  0x45   :  { %524 = vsyncadd [#allocation3], 4294967040 }
  0x46   :  { %525 = dma.done.wait [#allocation6], 768  }
  0x47   :  { %526 = vsyncadd [#allocation6], 4294966528 }
  0x48   :  { %527 = dma.done.wait [#allocation9], 512  }
  0x49   :  { %528 = vsyncadd [#allocation9], 4294966784  ;;  %v141_v0 = vld [vmem:[#allocation7] sm:$0xff]  ;;  %v142_v1 = vld [vmem:[#allocation7 + $0x8] sm:$0xff]  ;;  %vm87_vm0 = vcmask 261120  }
  0x4a   :  { %v145_v2 = vld [vmem:[#allocation8] sm:$0xff]  ;;  %v386_v3 = vpack.c.bf16 %v142_v1, %v141_v0  ;;  %v146_v4 = vld [vmem:[#allocation8 + $0x8] sm:$0xff]  ;;  %v143_v5 = vld [vmem:[#allocation7 + $0x10] sm:$0xff] }
  0x4b   :  { %v144_v6 = vld [vmem:[#allocation7 + $0x18] sm:$0xff]  ;;  %v394_v7 = vpack.c.bf16 %v146_v4, %v145_v2  ;;  %v147_v9 = vld [vmem:[#allocation8 + $0x10] sm:$0xff]  ;;  %v85_v13 = vld [vmem:[#allocation2] sm:$0xff] }
  0x4c   :  { %v390_v8 = vpack.c.bf16 %v144_v6, %v143_v5  ;;  %v148_v10 = vld [vmem:[#allocation8 + $0x18] sm:$0xff]  ;;  %v139_v11 = vld [vmem:[#allocation5] sm:$0xff]  ;;  %387 = vmatprep.subr.bf16.mxu0 %v386_v3  ;;  %v86_v14 = vld [vmem:[#allocation2 + $0x8] sm:$0xff]  ;;  %v88_v15 = vsel %vm87_vm0, %v85_v13, 0.0  ;;  %v97_v16 = vmul.f32 %v85_v13, %v85_v13 }
  0x4d   :  { %v398_v12 = vpack.c.bf16 %v148_v10, %v147_v9  ;;  %372 = vmatprep.mubr.msk.f32.mxu0 %vm87_vm0, %v139_v11  ;;  %389 = vmatpush3.bf16.msra.mxu0 %v386_v3  ;;  %v98_v17 = vmul.f32 %v86_v14, %v86_v14  ;;  %v140_v19 = vld [vmem:[#allocation5 + $0x8] sm:$0xff]  ;;  %v91_v20 = vsel %vm87_vm0, %v86_v14, 0.0  ;;  %v344_v44 = vld [vmem:[%s700_s6] ss:$0 sm:$0xff] }
  0x4e   :  { %395 = vmatprep.subr.bf16.mxu1 %v394_v7  ;;  %391 = vmatprep.subr.bf16.mxu0 %v390_v8  ;;  %v99_v18 = vsel %vm87_vm0, %v97_v16, 0.0  ;;  %v346_v46 = vld [vmem:[%s698_s4] ss:$0 sm:$0xff]  ;;  %s537_s4 = smov [#allocation10]  }
  0x4f   :  { %397 = vmatpush3.bf16.msra.mxu1 %v394_v7  ;;  %383 = vmatprep.mubr.msk.f32.mxu1 %vm87_vm0, %v139_v11  ;;  %v102_v21 = vsel %vm87_vm0, %v98_v17, 0.0  ;;  %v345_v48 = vld [vmem:[%s701_s7] ss:$0 sm:$0xff]  ;;  %s330_s6 = sshll.u32 %s537_s4, 4  ;;  %s331_s6 = int_to_ptr.vmem [resolvable:$true] %s330_s6 }
  0x50   :  { %399 = vmatprep.subr.bf16.mxu1 %v398_v12  ;;  %89 = vadd.xlane.f32.xlu0 %v88_v15  ;;  %v349_v49 = vld [vmem:[%s699_s5] ss:$0 sm:$0xff]  ;;  %s501_s5 = scalar_lea.vmem %s331_s6, 256  ;;  %p506_p5 = scmp.lt.s32.totalorder %s331_s6, %s331_s6 }
  0x51   :  { %100 = vadd.xlane.f32.xlu1 %v99_v18  ;;  %393 = vmatpush3.bf16.msra.mxu0 %v390_v8  ;;  %p502_p4 = scmp.ne.s32.totalorder %s331_s6, %s501_s5  ;;  %p507_p6 = scmp.lt.s32.totalorder %s501_s5, %s501_s5 }
  0x53   :  { %401 = vmatpush3.bf16.msra.mxu1 %v398_v12  ;;  %p508_p7 = por %p507_p6, %p506_p5 }
  0x54   :  { %373 = vmatmul.mubr.msk.f32.vlgmr.msra.gmra.mrb[0].mxu0 %vm87_vm0, %v140_v19  ;;  %92 = vadd.xlane.f32.xlu0 %v91_v20 }
  0x55   :  { %103 = vadd.xlane.f32.xlu1 %v102_v21  ;;  %p509_p8 = pnand %p508_p7, %p502_p4 }
  0x56   :  { %384 = vmatmul.mubr.msk.f32.vlgmr.msra.gmra.mrb[0].mxu1 %vm87_vm0, %v140_v19 }
  0xdd   :  { %v90_v22 = vpop.xlane.xlu0 %89 }
  0xde   :  { %v101_v23 = vpop.xlane.xlu1 %100  ;;  %v95_v26 = vmul.f32 0.03125, %v90_v22 }
  0xdf   :  { %v105_v31 = vmul.f32 0.03125, %v101_v23 }
  0xe0   :  { %v107_v30 = vmul.f32 %v95_v26, %v95_v26  ;;  %v113_v40 = vsub.f32 %v85_v13, %v95_v26 }
  0xe1   :  { %v93_v24 = vpop.xlane.xlu0 %92 }
  0xe2   :  { %v96_v25 = vmul.f32 0.03125, %v93_v24  ;;  %v104_v27 = vpop.xlane.xlu1 %103  ;;  %v109_v33 = vsub.f32 %v105_v31, %v107_v30 }
  0xe3   :  { %v106_v29 = vmul.f32 0.03125, %v104_v27 }
  0xe4   :  { %v108_v28 = vmul.f32 %v96_v25, %v96_v25  ;;  %v111_v35 = vmax.f32 %v109_v33, 0.0  ;;  %v114_v38 = vsub.f32 %v86_v14, %v96_v25 }
  0xe6   :  { %v110_v32 = vsub.f32 %v106_v29, %v108_v28  ;;  %v115_v37 = vadd.f32 1e-05, %v111_v35 }
  0xe8   :  { %v112_v34 = vmax.f32 %v110_v32, 0.0 }
  0xea   :  { %v116_v36 = vadd.f32 1e-05, %v112_v34 }
  0xec   :  { %409 = vrsqrt.f32 %v116_v36 }
  0xed   :  { %411 = vrsqrt.f32 %v115_v37 }
  0xf6   :  { %v410_v39 = vpop.eup %409 }
  0xf7   :  { %v412_v41 = vpop.eup %411  ;;  %v120_v42 = vmul.f32 %v410_v39, %v114_v38 }
  0xf8   :  { %v119_v43 = vmul.f32 %v412_v41, %v113_v40 }
  0xf9   :  { %v129_v45 = vmul.f32 %v344_v44, %v120_v42 }
  0xfa   :  { %v128_v47 = vmul.f32 %v344_v44, %v119_v43 }
  0xfb   :  { %v138_v51 = vadd.f32 %v345_v48, %v129_v45 }
  0xfc   :  { %v137_v55 = vadd.f32 %v345_v48, %v128_v47 }
 0x127   :  { %v374_v50 = vpop.f32.mrb[0].mxu0 }
 0x128   :  { %v234_v52 = vadd.f32 %v374_v50, %v346_v46  ;;  %v228_v53 = vpop.f32.mrb[1].mxu0 }
 0x129   :  { %v385_v54 = vpop.f32.mrb[0].mxu1  ;;  %v229_v56 = vadd.f32 %v346_v46, %v228_v53 }
 0x12a   :  { %v316_v57 = vadd.f32 %v385_v54, %v349_v49  ;;  %v310_v58 = vpop.f32.mrb[1].mxu1  ;;  %v320_v59 = vmul.f32 %v234_v52, %v138_v51 }
 0x12b   :  { %v311_v60 = vadd.f32 %v349_v49, %v310_v58  ;;  %v319_v61 = vmul.f32 %v229_v56, %v137_v55 }
 0x12c   :  { %v322_v62 = vadd.f32 %v320_v59, %v316_v57 }
 0x12d   :  { %v321_v63 = vadd.f32 %v319_v61, %v311_v60 }
 0x12e   :  { %324 = vst.msk [vmem:[#allocation10 + $0x8] sm:$0xff] %vm87_vm0, %v322_v62 }
 0x12f   :  { %323 = vst.msk [vmem:[#allocation10] sm:$0xff] %vm87_vm0, %v321_v63 }
 0x130   :  { %512 = shalt.err (!%p509_p8)
}
 0x131   :  { %s513_s20 = scalar_lea.hbm %s702_s8, 256 }
 0x132   :  { %p514_p9 = scmp.ne.s32.totalorder %s702_s8, %s513_s20  ;;  %p517_p10 = scmp.lt.u32.totalorder %s513_s20, %s702_s8 }
 0x134   :  { %p519_p11 = pnand %p517_p10, %p514_p9 }
 0x136   :  { %522 = shalt.err (!%p519_p11)
}
 0x137   :  { %336 = dma.vmem_to_hbm [thread:$0]  %s331_s6, 256, %s702_s8, [#allocation4], %s533_s17, %s533_s17, %s534_s18  }
 0x138   :  { %529 = dma.done.wait [#allocation4], 256  }
 0x139   :  { %530 = vsyncadd [#allocation4], 4294967040 }
 0x13a   :  { %340 = vsyncpa [#allocation3], 1 }
 0x13b   :  { %341 = vsyncpa [#allocation6], 1 }
 0x13c   :  { %342 = vsyncpa [#allocation9], 1 }
 0x13d   :  { %343 = vsyncpa [#allocation4], 1 }

</bundles_post_ra>
